<compile_context>
chip_gen: v7x
topology: tpu7x:2x2x1
jax: 0.10.0
libtpu: 0.0.40
codegen_flags: <defaults>
</compile_context>

<pallas_src>
import functools

import jax
import jax.numpy as jnp
from jax.experimental import pallas as pl
from jax.experimental.pallas import tpu as pltpu


def _round_up(x, m):
    return ((x + m - 1) // m) * m


def _vmem_capacity_bytes():
    """Physical VMEM of the current TPU generation (conservative fallback)."""
    try:
        info = pltpu.get_tpu_info()
        cap = getattr(info, "vmem_capacity_bytes", None)
        if cap:
            return int(cap)
    except Exception:
        pass
    return 64 * 1024 * 1024  # v7x per-TC (smallest of the targets)


def _pick_hidden_tile(hidden, target):
    """Largest multiple-of-128 divisor of `hidden` that is <= target; else full."""
    if hidden <= target:
        return hidden
    tk = (target // 128) * 128
    while tk >= 128:
        if hidden % tk == 0:
            return tk
        tk -= 128
    return hidden  # no clean 128-multiple divisor: keep hidden resident


def _shrink_tk(hidden, tk):
    """Next smaller multiple-of-128 divisor of `hidden` below tk (or tk)."""
    cand = tk - 128
    while cand >= 128:
        if hidden % cand == 0:
            return cand
        cand -= 128
    return tk


def _vmem_estimate(tm, tk, n_embd):
    """Working-set estimate for the chosen tiles (double-buffered I/O)."""
    return (2 * tm * n_embd * 2        # x tiles (bf16)
            + 2 * n_embd * tk * 2      # W1 chunks (bf16)
            + 2 * tk * n_embd * 2      # W2 chunks (bf16)
            + 2 * (tk + n_embd) * 4    # biases (f32)
            + 2 * tm * n_embd * 4      # output tiles (f32 accumulator)
            + 2 * tm * n_embd * 4      # dropout scale tiles (f32), worst case
            + tm * tk * 4)             # hidden intermediate h (f32)


def _ffn_kernel(*refs, has_dropout):
    # x_ref:     (tm, n_embd)  bf16      w1_ref: (n_embd, tk)  bf16
    # b1_ref:    (1, tk)       f32       w2_ref: (tk, n_embd)  bf16
    # b2_ref:    (1, n_embd)   f32       o_ref:  (tm, n_embd)  f32 (accumulator)
    # scale_ref: (tm, n_embd)  f32       (only when has_dropout)
    if has_dropout:
        x_ref, w1_ref, b1_ref, w2_ref, b2_ref, scale_ref, o_ref = refs
    else:
        x_ref, w1_ref, b1_ref, w2_ref, b2_ref, o_ref = refs
        scale_ref = None

    k = pl.program_id(1)
    nk = pl.num_programs(1)

    @pl.when(k == 0)
    def _init():
        o_ref[...] = jnp.zeros_like(o_ref)

    h = jnp.dot(x_ref[...], w1_ref[...], preferred_element_type=jnp.float32)
    h = jnp.maximum(h + b1_ref[...], 0.0).astype(jnp.bfloat16)   # ReLU -> bf16 MXU
    o_ref[...] += jnp.dot(h, w2_ref[...], preferred_element_type=jnp.float32)

    @pl.when(k == nk - 1)
    def _finalize():
        y = o_ref[...] + b2_ref[...]
        if scale_ref is not None:
            y = y * scale_ref[...]   # inverted dropout: keep ? 1/(1-p) : 0
        o_ref[...] = y


def feedforward(x, w1, b1, w2, b2, *, dropout_p=0.2, training=False, seed=0,
                row_tile=None, hidden_tile=None):
    """x: (B, T, n_embd). w1: (n_embd, 4*n_embd), w2: (4*n_embd, n_embd).
    Returns (B, T, n_embd) matching torch's Linear->ReLU->Linear->Dropout."""
    B, T, n_embd = x.shape
    hidden = w1.shape[1]
    rows = B * T

    vmem_cap = _vmem_capacity_bytes()
    budget = int(vmem_cap * 0.75)          # ~96 MiB on 128-MiB parts, ~48 MiB on v7x

    if row_tile is None:
        row_tile = 1024 if vmem_cap >= 100 * 2**20 else 512
    if hidden_tile is None:
        if vmem_cap >= 100 * 2**20:
            hidden_tile = 2048
        else:
            hidden_tile = 512 if n_embd >= 4096 else 1024

    tm = min(row_tile, _round_up(rows, 16))
    tk = _pick_hidden_tile(hidden, hidden_tile)
    # Fit the VMEM budget: shrink tk first (~0.35us/step grid overhead), then tm
    # (tm sets the weight-traffic arithmetic intensity, so trade it last).
    while _vmem_estimate(tm, tk, n_embd) > budget:
        new_tk = _shrink_tk(hidden, tk)
        if new_tk < tk:
            tk = new_tk
        elif tm > 16:
            tm = max(16, _round_up(tm // 2, 16))
        else:
            break

    padded_rows = _round_up(rows, tm)

    # bf16 x once in the wrapper (halves x HBM traffic / x double-buffer VMEM).
    x2 = x.reshape(rows, n_embd).astype(jnp.bfloat16)
    if padded_rows != rows:
        x2 = jnp.pad(x2, ((0, padded_rows - rows), (0, 0)))

    # Weights: no-op if the caller pre-cast with prepare_params().
    w1b = w1 if w1.dtype == jnp.bfloat16 else w1.astype(jnp.bfloat16)
    w2b = w2 if w2.dtype == jnp.bfloat16 else w2.astype(jnp.bfloat16)
    b1f = b1.astype(jnp.float32).reshape(1, hidden)
    b2f = b2.astype(jnp.float32).reshape(1, n_embd)

    has_dropout = bool(training) and dropout_p > 0.0
    grid = (padded_rows // tm, hidden // tk)
    n_row_tiles = grid[0]

    in_specs = [
        pl.BlockSpec((tm, n_embd), lambda i, k: (i, 0)),   # x rows (resident over k)
        pl.BlockSpec((n_embd, tk), lambda i, k: (0, k)),   # W1 chunk
        pl.BlockSpec((1, tk), lambda i, k: (0, k)),        # b1 chunk
        pl.BlockSpec((tk, n_embd), lambda i, k: (k, 0)),   # W2 chunk
        pl.BlockSpec((1, n_embd), lambda i, k: (0, 0)),    # b2
    ]
    inputs = [x2, w1b, b1f, w2b, b2f]

    if has_dropout:
        # Inverted-dropout keep/scale mask (torch Dropout training semantics;
        # RNG stream differs from torch). Built outside the kernel so the
        # kernel stays free of TPU-only PRNG primitives.
        # TODO(synk): move mask generation in-kernel via pltpu.prng_random_bits
        # once the in-kernel TPU PRNG is available on every deployment target.
        keep = jax.random.bernoulli(jax.random.PRNGKey(seed), 1.0 - dropout_p,
                                    (padded_rows, n_embd))
        scale = keep.astype(jnp.float32) * jnp.float32(1.0 / (1.0 - dropout_p))
        in_specs.append(pl.BlockSpec((tm, n_embd), lambda i, k: (i, 0)))
        inputs.append(scale)

    vmem_est = _vmem_estimate(tm, tk, n_embd)
    vmem_limit = int(min(budget, max(32 * 1024 * 1024, 2 * vmem_est)))
    vmem_limit = max(vmem_limit, vmem_est)

    # Weights are re-streamed once per row tile: count them that many times.
    weight_bytes = (w1b.size + w2b.size) * 2 * n_row_tiles
    cost = pl.CostEstimate(
        flops=4 * padded_rows * n_embd * hidden,   # two matmuls
        transcendentals=0,
        bytes_accessed=(x2.size * 2
                        + weight_bytes
                        + (b1f.size + b2f.size) * 4 * n_row_tiles
                        + padded_rows * n_embd * 4 * (2 if has_dropout else 1)),
    )

    kernel = functools.partial(_ffn_kernel, has_dropout=has_dropout)

    out2 = pl.pallas_call(
        kernel,
        out_shape=jax.ShapeDtypeStruct((padded_rows, n_embd), jnp.float32),
        grid_spec=pltpu.PrefetchScalarGridSpec(
            num_scalar_prefetch=0,
            grid=grid,
            in_specs=in_specs,
            out_specs=pl.BlockSpec((tm, n_embd), lambda i, k: (i, 0)),
        ),
        compiler_params=pltpu.CompilerParams(
            dimension_semantics=("parallel", "arbitrary"),
            vmem_limit_bytes=vmem_limit),
        cost_estimate=cost,
    )(*inputs)

    out = out2[:rows].reshape(B, T, n_embd)
    return out if x.dtype == jnp.float32 else out.astype(x.dtype)
    # TODO(synk): for very small n_embd (<128) output stores are lane-masked;
    # real GPT widths (n_embd >= 128) hit the lane-dense fast path.


def init_params(key, n_embd):
    """Deterministic init matching nn.Linear shapes (uniform +/- 1/sqrt(fan_in))."""
    hidden = 4 * n_embd
    k1, k2, k3, k4 = jax.random.split(key, 4)
    lim1 = 1.0 / jnp.sqrt(n_embd)
    lim2 = 1.0 / jnp.sqrt(hidden)
    w1 = jax.random.uniform(k1, (n_embd, hidden), jnp.float32, -lim1, lim1)
    b1 = jax.random.uniform(k2, (1, hidden), jnp.float32, -lim1, lim1)
    w2 = jax.random.uniform(k3, (hidden, n_embd), jnp.float32, -lim2, lim2)
    b2 = jax.random.uniform(k4, (1, n_embd), jnp.float32, -lim2, lim2)
    return w1, b1, w2, b2


def prepare_params(w1, b1, w2, b2):
    """Cast weights to bf16 ONCE so feedforward() does no per-call weight casts."""
    return (w1.astype(jnp.bfloat16), b1.astype(jnp.float32),
            w2.astype(jnp.bfloat16), b2.astype(jnp.float32))


if __name__ == "__main__":
    key = jax.random.PRNGKey(0)
    B, T, n_embd = 2, 8, 32
    kx, kp = jax.random.split(key)
    x = jax.random.normal(kx, (B, T, n_embd), jnp.float32)
    w1, b1, w2, b2 = init_params(kp, n_embd)
    w1b, b1f, w2b, b2f = prepare_params(w1, b1, w2, b2)   # cast once, reuse

    # Eval-mode forward (Dropout is identity in eval).
    out = feedforward(x, w1b, b1f, w2b, b2f, dropout_p=0.2, training=False)
    out = jax.block_until_ready(out)
    assert out.shape == (B, T, n_embd)

    # Reference mirroring the kernel numerics (bf16 MXU inputs, f32 accumulation).
    x2 = x.reshape(-1, n_embd)
    h_ref = jnp.dot(x2.astype(jnp.bfloat16), w1.astype(jnp.bfloat16),
                    preferred_element_type=jnp.float32) + b1.reshape(1, -1)
    h_ref = jnp.maximum(h_ref, 0.0).astype(jnp.bfloat16)
    ref = jnp.dot(h_ref, w2.astype(jnp.bfloat16),
                  preferred_element_type=jnp.float32) + b2.reshape(1, -1)
    assert jnp.allclose(out.reshape(-1, n_embd), ref, atol=1e-2, rtol=1e-2)

    # Training-mode forward (inverted dropout via precomputed keep/scale mask).
    out_tr = feedforward(x, w1b, b1f, w2b, b2f, dropout_p=0.2, training=True,
                         seed=123)
    out_tr = jax.block_until_ready(out_tr)
    assert out_tr.shape == (B, T, n_embd)
    assert bool(jnp.all(jnp.isfinite(out_tr)))
    drop_frac = float(jnp.mean(out_tr == 0.0))
    assert 0.05 < drop_frac < 0.45, f"unexpected dropout fraction {drop_frac}"

    print("KERNEL_OK")
</pallas_src>

<mosaic_0001>
module attributes {stable_mosaic.version = 11 : i64} {
  func.func @_ffn_kernel(%arg0: i32, %arg1: i32, %arg2: memref<16x32xbf16, #tpu.memory_space<vmem>>, %arg3: memref<32x128xbf16, #tpu.memory_space<vmem>>, %arg4: memref<1x128xf32, #tpu.memory_space<vmem>>, %arg5: memref<128x32xbf16, #tpu.memory_space<vmem>>, %arg6: memref<1x32xf32, #tpu.memory_space<vmem>>, %arg7: memref<16x32xf32, #tpu.memory_space<vmem>>) attributes {dimension_semantics = [#tpu.dimension_semantics<parallel>, #tpu.dimension_semantics<arbitrary>], iteration_bounds = array<i64: 1, 1>, scalar_prefetch = 0 : i64, scratch_operands = 0 : i64, tpu.core_type = #tpu.core_type<tc>, window_params = [{transform_indices = @transform_0, window_bounds = array<i64: 16, 32>}, {transform_indices = @transform_1, window_bounds = array<i64: 32, 128>}, {transform_indices = @transform_2, window_bounds = array<i64: 1, 128>}, {transform_indices = @transform_3, window_bounds = array<i64: 128, 32>}, {pipeline_mode = #tpu.pipeline_mode<synchronous>, transform_indices = @transform_4, window_bounds = array<i64: 1, 32>}, {transform_indices = @transform_5, window_bounds = array<i64: 16, 32>}]} {
    %c0_i32 = arith.constant 0 : i32
    %0 = arith.cmpi eq, %arg1, %c0_i32 : i32
    %1 = arith.extui %0 : i1 to i32
    %c0_i32_0 = arith.constant 0 : i32
    %2 = arith.cmpi ne, %1, %c0_i32_0 : i32
    scf.if %2 {
      %cst_16 = arith.constant 0.000000e+00 : f32
      %20 = vector.broadcast %cst_16 : f32 to vector<16x32xf32>
      %c0_17 = arith.constant 0 : index
      %c0_18 = arith.constant 0 : index
      %21 = vector.load %arg7[%c0_17, %c0_18] : memref<16x32xf32, #tpu.memory_space<vmem>>, vector<16x32xf32>
      tpu.vector_store %arg7[%c0_17, %c0_18], %20 {strides = array<i32>} : memref<16x32xf32, #tpu.memory_space<vmem>>, vector<16x32xf32>,
    } else {
    }
    %c0 = arith.constant 0 : index
    %c0_1 = arith.constant 0 : index
    %3 = vector.load %arg2[%c0, %c0_1] : memref<16x32xbf16, #tpu.memory_space<vmem>>, vector<16x32xbf16>
    %c0_2 = arith.constant 0 : index
    %c0_3 = arith.constant 0 : index
    %4 = vector.load %arg3[%c0_2, %c0_3] : memref<32x128xbf16, #tpu.memory_space<vmem>>, vector<32x128xbf16>
    %cst = arith.constant dense<0.000000e+00> : vector<16x128xf32>
    %5 = tpu.matmul %3, %4, %cst {dimension_numbers = #tpu.dot_dimension_numbers<[1], [0], [0], [1], [0, 0, 1, 1], [], []>} : vector<16x32xbf16>, vector<32x128xbf16>, vector<16x128xf32> -> vector<16x128xf32>
    %c0_4 = arith.constant 0 : index
    %c0_5 = arith.constant 0 : index
    %6 = vector.load %arg4[%c0_4, %c0_5] : memref<1x128xf32, #tpu.memory_space<vmem>>, vector<1x128xf32>
    %7 = vector.broadcast %6 : vector<1x128xf32> to vector<16x128xf32>
    %8 = arith.addf %5, %7 : vector<16x128xf32>
    %cst_6 = arith.constant 0.000000e+00 : f32
    %9 = vector.broadcast %cst_6 : f32 to vector<16x128xf32>
    %10 = arith.maximumf %8, %9 : vector<16x128xf32>
    %11 = arith.truncf %10 : vector<16x128xf32> to vector<16x128xbf16>
    %c0_7 = arith.constant 0 : index
    %c0_8 = arith.constant 0 : index
    %12 = vector.load %arg7[%c0_7, %c0_8] : memref<16x32xf32, #tpu.memory_space<vmem>>, vector<16x32xf32>
    %c0_9 = arith.constant 0 : index
    %c0_10 = arith.constant 0 : index
    %13 = vector.load %arg5[%c0_9, %c0_10] : memref<128x32xbf16, #tpu.memory_space<vmem>>, vector<128x32xbf16>
    %cst_11 = arith.constant dense<0.000000e+00> : vector<16x32xf32>
    %14 = tpu.matmul %11, %13, %cst_11 {dimension_numbers = #tpu.dot_dimension_numbers<[1], [0], [0], [1], [0, 0, 1, 1], [], []>} : vector<16x128xbf16>, vector<128x32xbf16>, vector<16x32xf32> -> vector<16x32xf32>
    %15 = arith.addf %12, %14 : vector<16x32xf32>
    %c0_12 = arith.constant 0 : index
    %c0_13 = arith.constant 0 : index
    %16 = vector.load %arg7[%c0_12, %c0_13] : memref<16x32xf32, #tpu.memory_space<vmem>>, vector<16x32xf32>
    tpu.vector_store %arg7[%c0_12, %c0_13], %15 {strides = array<i32>} : memref<16x32xf32, #tpu.memory_space<vmem>>, vector<16x32xf32>,
    %c0_i32_14 = arith.constant 0 : i32
    %17 = arith.cmpi eq, %arg1, %c0_i32_14 : i32
    %18 = arith.extui %17 : i1 to i32
    %c0_i32_15 = arith.constant 0 : i32
    %19 = arith.cmpi ne, %18, %c0_i32_15 : i32
    scf.if %19 {
      %c0_16 = arith.constant 0 : index
      %c0_17 = arith.constant 0 : index
      %20 = vector.load %arg7[%c0_16, %c0_17] : memref<16x32xf32, #tpu.memory_space<vmem>>, vector<16x32xf32>
      %c0_18 = arith.constant 0 : index
      %c0_19 = arith.constant 0 : index
      %21 = vector.load %arg6[%c0_18, %c0_19] : memref<1x32xf32, #tpu.memory_space<vmem>>, vector<1x32xf32>
      %22 = vector.broadcast %21 : vector<1x32xf32> to vector<16x32xf32>
      %23 = arith.addf %20, %22 : vector<16x32xf32>
      %c0_20 = arith.constant 0 : index
      %c0_21 = arith.constant 0 : index
      %24 = vector.load %arg7[%c0_20, %c0_21] : memref<16x32xf32, #tpu.memory_space<vmem>>, vector<16x32xf32>
      tpu.vector_store %arg7[%c0_20, %c0_21], %23 {strides = array<i32>} : memref<16x32xf32, #tpu.memory_space<vmem>>, vector<16x32xf32>,
    } else {
    }
    return
  }
  func.func @transform_0(%arg0: i32, %arg1: i32) -> (i32, i32) {
    %c0_i32 = arith.constant 0 : i32
    %c0_i32_0 = arith.constant 0 : i32
    return %arg0, %c0_i32 : i32, i32
  }
  func.func @transform_1(%arg0: i32, %arg1: i32) -> (i32, i32) {
    %c0_i32 = arith.constant 0 : i32
    %c0_i32_0 = arith.constant 0 : i32
    return %c0_i32, %arg1 : i32, i32
  }
  func.func @transform_2(%arg0: i32, %arg1: i32) -> (i32, i32) {
    %c0_i32 = arith.constant 0 : i32
    %c0_i32_0 = arith.constant 0 : i32
    return %c0_i32, %arg1 : i32, i32
  }
  func.func @transform_3(%arg0: i32, %arg1: i32) -> (i32, i32) {
    %c0_i32 = arith.constant 0 : i32
    %c0_i32_0 = arith.constant 0 : i32
    return %arg1, %c0_i32 : i32, i32
  }
  func.func @transform_4(%arg0: i32, %arg1: i32) -> (i32, i32) {
    %c0_i32 = arith.constant 0 : i32
    %c0_i32_0 = arith.constant 0 : i32
    %c0_i32_1 = arith.constant 0 : i32
    return %c0_i32, %c0_i32_0 : i32, i32
  }
  func.func @transform_5(%arg0: i32, %arg1: i32) -> (i32, i32) {
    %c0_i32 = arith.constant 0 : i32
    %c0_i32_0 = arith.constant 0 : i32
    return %arg0, %c0_i32 : i32, i32
  }
}

</mosaic_0001>

<bundles_post_ra>
// kernel: tpu_custom_call.1
= control target key start
LH: loop header
LB: loop body
LE: loop exit
PB: predicated region body
PF: predicated region fallthrough
CT: control target
= control target key end

     0   :  { %v344_v1 = vmov 0.0   ;;  %vm345_vm0 = vmmov 0   ;;  %vm26_vm1 = vcmask 261120   ;;  %s437_s0 = inlined_call_operand.vmem [shape: bf16[16,32], index: 0, kind: input, shape index: {}]   ;;  %s438_s1 = inlined_call_operand.vmem [shape: bf16[32,128], index: 1, kind: input, shape index: {}]   ;;  %s439_s2 = inlined_call_operand.vmem [shape: f32[1,128], index: 2, kind: input, shape index: {}]   ;;  %s440_s3 = inlined_call_operand.vmem [shape: bf16[128,32], index: 3, kind: input, shape index: {}]   ;;  %s441_s4 = inlined_call_operand.vmem [shape: f32[1,32], index: 4, kind: input, shape index: {}]   ;;  %s442_s5 = inlined_call_operand.hbm [shape: f32[16,32], index: 5, kind: output, shape index: {}]  }
   0x1   :  { %v309_v0 = vld [vmem:[%s438_s1] sm:$0xff]   ;;  %276 = vmatprep.subr.bf16.mxu0 %v344_v1  ;;  %284 = vmatprep.subr.bf16.mxu1 %v344_v1  ;;  %v310_v2 = vld [vmem:[%s438_s1 + $0x8] sm:$0xff]   ;;  %27 = vst.msk [vmem:[#allocation2] sm:$0xff] %vm26_vm1, %v344_v1  ;;  %28 = vst.msk [vmem:[#allocation2 + $0x8] sm:$0xff] %vm26_vm1, %v344_v1 }
   0x2   :  { %277 = vmatpush3.bf16.msra.mxu0 %v309_v0  ;;  %280 = vmatprep.mubr.msk.bf16.mxu0 %vm345_vm0, %v344_v1  ;;  %v312_v3 = vld [vmem:[%s440_s3] sm:$0xff]   ;;  %v313_v5 = vld [vmem:[%s440_s3 + $0x8] sm:$0xff]   ;;  %v314_v6 = vld [vmem:[%s440_s3 + $0x10] sm:$0xff]  }
   0x3   :  { %278 = vmatprep.subr.bf16.mxu0 %v344_v1  ;;  %300 = vmatprep.mubr.msk.bf16.mxu1 %vm345_vm0, %v344_v1  ;;  %v311_v4 = vld [vmem:[%s437_s0] sm:$0xff]  }
   0x4   :  { %285 = vmatpush3.bf16.msra.mxu1 %v312_v3 }
   0x5   :  { %286 = vmatprep.subr.bf16.mxu1 %v344_v1 }
   0x6   :  { %279 = vmatpush3.bf16.msra.mxu0 %v310_v2 }
   0x8   :  { %287 = vmatpush3.bf16.msra.mxu1 %v313_v5 }
   0x9   :  { %281 = vmatmul.mubr.msk.bf16.vlgmr.msra.gmra.mrb[0].mxu0 %vm26_vm1, %v311_v4  ;;  %288 = vmatprep.subr.bf16.mxu1 %v344_v1 }
   0xa   :  { %10 = vsyncpa [#allocation3], 0  ;;  %v315_v7 = vld [vmem:[%s440_s3 + $0x18] sm:$0xff]   ;;  %v316_v8 = vld [vmem:[%s440_s3 + $0x20] sm:$0xff]   ;;  %s346_s15 = smov [#allocation2]  }
   0xb   :  { %v317_v9 = vld [vmem:[%s440_s3 + $0x28] sm:$0xff]   ;;  %v318_v10 = vld [vmem:[%s440_s3 + $0x30] sm:$0xff]   ;;  %v319_v11 = vld [vmem:[%s440_s3 + $0x38] sm:$0xff]   ;;  %s239_s16 = sshll.u32 %s346_s15, 4  ;;  %s240_s16 = int_to_ptr.vmem [resolvable:$true] %s239_s16 }
   0xc   :  { %289 = vmatpush3.bf16.msra.mxu1 %v314_v6  ;;  %v250_v12 = vld [vmem:[%s439_s2] ss:$0 sm:$0xff]  ;;  %v108_v24 = vld [vmem:[#allocation2 + $0x8] sm:$0xff]  ;;  %s320_s17 = scalar_lea.vmem %s240_s16, 256  ;;  %p325_p1 = scmp.lt.s32.totalorder %s240_s16, %s240_s16 }
   0xd   :  { %290 = vmatprep.subr.bf16.mxu1 %v344_v1  ;;  %v107_v22 = vld [vmem:[#allocation2] sm:$0xff]  ;;  %p321_p0 = scmp.ne.s32.totalorder %s240_s16, %s320_s17  ;;  %p326_p2 = scmp.lt.s32.totalorder %s320_s17, %s320_s17 }
   0xe   :  { %v263_v30 = vld [vmem:[%s441_s4] ss:$0 sm:$0xff] }
   0xf   :  { %p327_p3 = por %p326_p2, %p325_p1 }
  0x10   :  { %291 = vmatpush3.bf16.msra.mxu1 %v315_v7 }
  0x11   :  { %292 = vmatprep.subr.bf16.mxu1 %v344_v1  ;;  %p328_p4 = pnand %p327_p3, %p321_p0 }
  0x14   :  { %293 = vmatpush3.bf16.msra.mxu1 %v316_v8 }
  0x15   :  { %294 = vmatprep.subr.bf16.mxu1 %v344_v1 }
  0x18   :  { %295 = vmatpush3.bf16.msra.mxu1 %v317_v9 }
  0x19   :  { %296 = vmatprep.subr.bf16.mxu1 %v344_v1 }
  0x1c   :  { %297 = vmatpush3.bf16.msra.mxu1 %v318_v10 }
  0x1d   :  { %298 = vmatprep.subr.bf16.mxu1 %v344_v1 }
  0x20   :  { %299 = vmatpush3.bf16.msra.mxu1 %v319_v11 }
  0xdc   :  { %v97_v13 = vpop.f32.mrb[0].mxu0 }
  0xdd   :  { %v98_v14 = vadd.f32 %v250_v12, %v97_v13  ;;  %v282_v15 = vpop.f32.mrb[1].mxu0 }
  0xde   :  { %v100_v16 = vpop.f32.mrb[2].mxu0 }
  0xdf   :  { %v101_v17 = vadd.f32 %v250_v12, %v100_v16  ;;  %v283_v18 = vpop.f32.mrb[3].mxu0  ;;  %v104_v19 = vmax.f32 %v98_v14, 0.0 }
  0xe1   :  { %v105_v20 = vmax.f32 %v101_v17, 0.0 }
  0xe3   :  { %v106_v21 = vpack.c.bf16 %v105_v20, %v104_v19 }
  0xe5   :  { %301 = vmatmul.mubr.bf16.vlgmr.msra.gmra.mrb[0].mxu1 %v106_v21 }
 0x1b8   :  { %v207_v23 = vpop.f32.mrb[0].mxu1 }
 0x1b9   :  { %v214_v25 = vadd.f32 %v207_v23, %v107_v22  ;;  %v302_v26 = vpop.f32.mrb[1].mxu1 }
 0x1ba   :  { %v210_v27 = vpop.f32.mrb[2].mxu1 }
 0x1bb   :  { %216 = vst.msk [vmem:[#allocation2] sm:$0xff] %vm26_vm1, %v214_v25  ;;  %v215_v28 = vadd.f32 %v210_v27, %v108_v24  ;;  %v303_v29 = vpop.f32.mrb[3].mxu1 }
 0x1bd   :  { %217 = vst.msk [vmem:[#allocation2 + $0x8] sm:$0xff] %vm26_vm1, %v215_v28 }
 0x1c2   :  { %v221_v31 = vld [vmem:[#allocation2] sm:$0xff] }
 0x1c3   :  { %v230_v32 = vadd.f32 %v263_v30, %v221_v31 }
 0x1c4   :  { %v222_v33 = vld [vmem:[#allocation2 + $0x8] sm:$0xff] }
 0x1c5   :  { %v231_v34 = vadd.f32 %v263_v30, %v222_v33  ;;  %232 = vst.msk [vmem:[#allocation2] sm:$0xff] %vm26_vm1, %v230_v32 }
 0x1c7   :  { %233 = vst.msk [vmem:[#allocation2 + $0x8] sm:$0xff] %vm26_vm1, %v231_v34 }
 0x1c8   :  { %331 = shalt.err (!%p328_p4)
}
 0x1c9   :  { %s332_s19 = scalar_lea.hbm %s442_s5, 256 }
 0x1ca   :  { %p333_p5 = scmp.ne.s32.totalorder %s442_s5, %s332_s19  ;;  %p336_p6 = scmp.lt.u32.totalorder %s332_s19, %s442_s5 }
 0x1cc   :  { %p338_p7 = pnand %p336_p6, %p333_p5 }
 0x1ce   :  { %341 = shalt.err (!%p338_p7)
}
 0x1cf   :  { %s347_s24 = smov 128   ;;  %s348_s25 = smov 8  }
 0x1d0   :  { %245 = dma.vmem_to_hbm [thread:$0]  %s240_s16, 256, %s442_s5, [#allocation3], %s347_s24, %s347_s24, %s348_s25  }
 0x1d1   :  { %342 = dma.done.wait [#allocation3], 256  }
 0x1d2   :  { %343 = vsyncadd [#allocation3], 4294967040 }
 0x1d3   :  { %249 = vsyncpa [#allocation3], 1 }

</bundles_post_ra>
